<compile_context>
chip_gen: v7x
topology: tpu7x:2x2x1
jax: 0.10.0
libtpu: 0.0.40
codegen_flags: <defaults>
</compile_context>

<pallas_src>
import functools

import jax
import jax.numpy as jnp
from jax.experimental import pallas as pl
from jax.experimental.pallas import tpu as pltpu

DIM = 384
NORM_P = 1        # TransE default norm=1 (L1 distance)
MARGIN = 1.0

# 32 MiB scoped-VMEM limit: equals the v6e/v7x default, raises v5e's 16 MiB so
# the larger tiles below (<=24 MiB of buffers) compile on every generation.
_VMEM_LIMIT_BYTES = 32 * 1024 * 1024


def _dim_semantics(n_axes):
    """Grid-dimension semantics: CORE_PARALLEL only helps (and only matters)
    on v7x's 2-TensorCore chips; plain "parallel" elsewhere."""
    try:
        kind = jax.devices()[0].device_kind.lower()
        if "v7" in kind:
            return (pltpu.CORE_PARALLEL,) * n_axes
    except Exception:
        pass
    return ("parallel",) * n_axes


# ---------------------------------------------------------------------------
# Kernel 1: L2 row-normalization of the entity embedding table rows [:-1].
#           Row-tiled; only the last tile carries the padding-row guard.
# ---------------------------------------------------------------------------
def _entity_norm_kernel(w_ref, o_ref, *, pad_row_local):
    w = w_ref[...]                                                  # (TR, D) f32
    inv_norm = jax.lax.rsqrt(jnp.sum(w * w, axis=1, keepdims=True)) # EUP rsqrt
    normed = w * inv_norm

    is_last = pl.program_id(0) == pl.num_programs(0) - 1

    @pl.when(jnp.logical_not(is_last))
    def _():
        o_ref[...] = normed

    @pl.when(is_last)
    def _():
        # Only this tile contains the padding row (global row E = E1-1);
        # copy it through unnormalized, like weight.data[:-1, :] in torch.
        row_ids = jax.lax.broadcasted_iota(jnp.int32, w.shape, 0)
        o_ref[...] = jnp.where(row_ids < pad_row_local, normed, w)


def normalize_entities(w, *, row_tile=4096):
    """L2-normalize rows [:-1] of w in place (aliased input/output)."""
    E1, D = w.shape
    # Row tile: multiple of 8 sublanes, capped at row_tile.
    # 4096 rows -> 4 buffers * 6 MiB = 24 MiB VMEM: fits the explicit 32 MiB
    # scoped limit on every generation (v5e/v6e have 128 MiB physical, v7x 64).
    TR = min(8 * pl.cdiv(row_tile, 8), 8 * pl.cdiv(E1, 8))
    num_tiles = pl.cdiv(E1, TR)
    pad_row_local = (E1 - 1) - (num_tiles - 1) * TR  # padding row index in last tile

    return pl.pallas_call(
        functools.partial(_entity_norm_kernel, pad_row_local=pad_row_local),
        out_shape=jax.ShapeDtypeStruct((E1, D), w.dtype),
        grid=(num_tiles,),
        in_specs=[pl.BlockSpec((TR, D), lambda i: (i, 0))],
        out_specs=pl.BlockSpec((TR, D), lambda i: (i, 0)),
        input_output_aliases={0: 0},   # in-place: no second full-size table in HBM
        compiler_params=pltpu.CompilerParams(
            dimension_semantics=_dim_semantics(1),
            vmem_limit_bytes=_VMEM_LIMIT_BYTES),
        cost_estimate=pl.CostEstimate(
            flops=3 * E1 * D,
            transcendentals=E1,
            bytes_accessed=2 * E1 * D * 4),
    )(w)


# ---------------------------------------------------------------------------
# Kernel 2: TransE distances (p-norm reduction) + margin-ranking loss.
#           8 separately pipelined (TB, D) operand streams (h1/h2/rel/sbert for
#           pos and neg).  Output is one (3, TB) block: rows =
#           [loss, pos_d, neg_d], batch on the lane axis (lane-dense stores).
# ---------------------------------------------------------------------------
def _transe_loss_kernel(ph1, ph2, pr, pe, nh1, nh2, nr, ne, out_ref):
    def dist(h1_ref, h2_ref, r_ref, e_ref):
        x = (h1_ref[...] + h2_ref[...]) * 0.5 + r_ref[...] - e_ref[...]  # (TB, D)
        if NORM_P == 1:
            return jnp.sum(jnp.abs(x), axis=1)                           # (TB,)
        return jnp.sqrt(jnp.sum(x * x, axis=1))

    dp = dist(ph1, ph2, pr, pe)
    dn = dist(nh1, nh2, nr, ne)
    # MarginRankingLoss(margin, reduction='none') with target = -1:
    #   loss = max(0, -(-1)*(pos - neg) + margin) = max(0, pos - neg + margin)
    loss = jnp.maximum(dp - dn + MARGIN, 0.0)
    # HBM-bound kernel; the small (3, TB) store is lane-dense on the batch axis.
    out_ref[...] = jnp.stack([loss, dp, dn], axis=0)                     # (3, TB)


def transe_forward(entities_w, relations_w,
                   positive_triplets, negative_triplets,
                   positive_embeddings, negative_embeddings,
                   *, row_tile=4096, batch_tile=1024):
    """Mirrors TransE.forward. Returns (loss, pos_dist, neg_dist, new_entities_w).

    new_entities_w carries the in-place entity normalization side-effect.
    """
    # side-effect from forward(): L2-normalize entity rows [:-1] (Pallas kernel 1)
    entities_w = normalize_entities(entities_w, row_tile=row_tile)

    B = positive_triplets.shape[0]
    D = entities_w.shape[1]

    # Embedding lookups stay as XLA gathers (glue).  No jnp.stack: the 8
    # gathered operands go straight into the kernel as separately pipelined
    # inputs, eliminating the 2x(4,B,D) stack materialization + re-read.
    # TODO(synk): fuse the gathers into the loss kernel (scalar-prefetched
    # triplet indices in SMEM + manual row-DMA gather into VMEM scratch) if the
    # remaining gather HBM round trip ever dominates.
    ph1 = jnp.take(entities_w, positive_triplets[:, 0], axis=0)
    ph2 = jnp.take(entities_w, positive_triplets[:, 1], axis=0)
    pr = jnp.take(relations_w, positive_triplets[:, 2], axis=0)
    nh1 = jnp.take(entities_w, negative_triplets[:, 0], axis=0)
    nh2 = jnp.take(entities_w, negative_triplets[:, 1], axis=0)
    nr = jnp.take(relations_w, negative_triplets[:, 2], axis=0)

    # Batch tiling: full-B block when small; lane-aligned (multiple of 128)
    # tiles when B grows so the (3, TB) output block stays legal and operand
    # buffers stay bounded (8 inputs * 2 bufs * TB*D*4 <= 24 MiB at TB=1024).
    if B <= batch_tile:
        TB = B
    else:
        TB = 128 * max(1, batch_tile // 128)
    num_btiles = pl.cdiv(B, TB)

    operand_spec = pl.BlockSpec((TB, D), lambda i: (i, 0))

    out = pl.pallas_call(
        _transe_loss_kernel,
        out_shape=jax.ShapeDtypeStruct((3, B), jnp.float32),
        grid=(num_btiles,),
        in_specs=[operand_spec] * 8,
        out_specs=pl.BlockSpec((3, TB), lambda i: (0, i)),
        compiler_params=pltpu.CompilerParams(
            dimension_semantics=_dim_semantics(1),
            vmem_limit_bytes=_VMEM_LIMIT_BYTES),
        cost_estimate=pl.CostEstimate(
            flops=12 * B * D,
            transcendentals=0,
            bytes_accessed=8 * B * D * 4 + 3 * B * 4),
    )(ph1, ph2, pr, positive_embeddings, nh1, nh2, nr, negative_embeddings)

    return out[0], out[1], out[2], entities_w


# ---------------------------------------------------------------------------
# Deterministic parameter init mirroring TransE.__init__ (no checkpoint load).
# ---------------------------------------------------------------------------
def init_params(key, entity_count, relation_count, dim):
    r = 6.0 / float(dim ** 0.5)
    ke, kr = jax.random.split(key)
    # entity table: (entity_count + 1, dim), uniform(-r, r) over ALL rows
    entities = jax.random.uniform(ke, (entity_count + 1, dim),
                                  minval=-r, maxval=r, dtype=jnp.float32)
    # relation table: uniform(-r, r), then rows [:-1] divided by their L1 norm
    relations = jax.random.uniform(kr, (relation_count + 1, dim),
                                   minval=-r, maxval=r, dtype=jnp.float32)
    l1 = jnp.sum(jnp.abs(relations[:-1, :]), axis=1, keepdims=True)
    relations = relations.at[:-1, :].set(relations[:-1, :] / l1)
    return entities, relations


if __name__ == "__main__":
    key = jax.random.PRNGKey(0)
    entity_count, relation_count, dim, batch = 16, 8, DIM, 8

    k_param, k_pt, k_nt, k_pe, k_ne = jax.random.split(key, 5)
    entities_w, relations_w = init_params(k_param, entity_count, relation_count, dim)

    def make_triplets(k):
        kh1, kh2, kr = jax.random.split(k, 3)
        h1 = jax.random.randint(kh1, (batch, 1), 0, entity_count, dtype=jnp.int32)
        h2 = jax.random.randint(kh2, (batch, 1), 0, entity_count, dtype=jnp.int32)
        rel = jax.random.randint(kr, (batch, 1), 0, relation_count, dtype=jnp.int32)
        return jnp.concatenate([h1, h2, rel], axis=1)              # (B, 3) int32

    pos_triplets = make_triplets(k_pt)
    neg_triplets = make_triplets(k_nt)
    pos_emb = jax.random.normal(k_pe, (batch, dim), dtype=jnp.float32)
    neg_emb = jax.random.normal(k_ne, (batch, dim), dtype=jnp.float32)

    fwd = jax.jit(transe_forward, static_argnames=("row_tile", "batch_tile"))

    # Pure-JAX reference of the same forward semantics.
    ref_ent = entities_w.at[:-1, :].set(
        entities_w[:-1, :]
        / jnp.linalg.norm(entities_w[:-1, :], ord=2, axis=1, keepdims=True))

    def ref_dist(trip, emb):
        h1 = ref_ent[trip[:, 0]]
        h2 = ref_ent[trip[:, 1]]
        r = relations_w[trip[:, 2]]
        return jnp.sum(jnp.abs((h1 + h2) / 2 + r - emb), axis=1)

    ref_pd = ref_dist(pos_triplets, pos_emb)
    ref_nd = ref_dist(neg_triplets, neg_emb)
    ref_loss = jnp.maximum(ref_pd - ref_nd + MARGIN, 0.0)

    # Run twice: defaults (single row tile) and row_tile=8 (multi-tile +
    # ragged-last-tile path, E1 = 17 rows -> grid of 3 row tiles).
    for rt in (4096, 8):
        loss, pos_d, neg_d, new_entities = fwd(
            entities_w, relations_w, pos_triplets, neg_triplets,
            pos_emb, neg_emb, row_tile=rt)
        jax.block_until_ready((loss, pos_d, neg_d, new_entities))

        assert loss.shape == (batch,) and pos_d.shape == (batch,) and neg_d.shape == (batch,)
        assert jnp.allclose(pos_d, ref_pd, rtol=1e-4, atol=1e-4)
        assert jnp.allclose(neg_d, ref_nd, rtol=1e-4, atol=1e-4)
        assert jnp.allclose(loss, ref_loss, rtol=1e-4, atol=1e-4)
        assert jnp.allclose(new_entities[:-1], ref_ent[:-1], rtol=1e-4, atol=1e-4)
        assert jnp.allclose(new_entities[-1], entities_w[-1])

    print("KERNEL_OK")
</pallas_src>

<mosaic_0001>
module attributes {stable_mosaic.version = 11 : i64} {
  func.func @_entity_norm_kernel(%arg0: i32, %arg1: memref<24x384xf32, #tpu.memory_space<vmem>>, %arg2: memref<24x384xf32, #tpu.memory_space<vmem>>) attributes {dimension_semantics = [#tpu.dimension_semantics<parallel>], iteration_bounds = array<i64: 1>, scalar_prefetch = 0 : i64, scratch_operands = 0 : i64, tpu.core_type = #tpu.core_type<tc>, window_params = [{transform_indices = @transform_0, window_bounds = array<i64: 24, 384>}, {transform_indices = @transform_1, window_bounds = array<i64: 24, 384>}]} {
    %c0 = arith.constant 0 : index
    %c0_0 = arith.constant 0 : index
    %0 = vector.load %arg1[%c0, %c0_0] : memref<24x384xf32, #tpu.memory_space<vmem>>, vector<24x384xf32>
    %1 = arith.mulf %0, %0 : vector<24x384xf32>
    %cst = arith.constant dense<0.000000e+00> : vector<24xf32>
    %2 = vector.multi_reduction <add>, %1, %cst [1] : vector<24x384xf32> to vector<24xf32>
    %3 = vector.shape_cast %2 : vector<24xf32> to vector<24x1xf32>
    %4 = math.rsqrt %3 : vector<24x1xf32>
    %5 = vector.broadcast %4 : vector<24x1xf32> to vector<24x384xf32>
    %6 = arith.mulf %0, %5 : vector<24x384xf32>
    %c0_i32 = arith.constant 0 : i32
    %7 = arith.cmpi eq, %arg0, %c0_i32 : i32
    %true = arith.constant true
    %8 = arith.xori %7, %true : i1
    %9 = arith.extui %8 : i1 to i32
    %c0_i32_1 = arith.constant 0 : i32
    %10 = arith.cmpi ne, %9, %c0_i32_1 : i32
    scf.if %10 {
      %c0_3 = arith.constant 0 : index
      %c0_4 = arith.constant 0 : index
      %13 = vector.load %arg2[%c0_3, %c0_4] : memref<24x384xf32, #tpu.memory_space<vmem>>, vector<24x384xf32>
      tpu.vector_store %arg2[%c0_3, %c0_4], %6 {strides = array<i32>} : memref<24x384xf32, #tpu.memory_space<vmem>>, vector<24x384xf32>,
    } else {
    }
    %11 = arith.extui %7 : i1 to i32
    %c0_i32_2 = arith.constant 0 : i32
    %12 = arith.cmpi ne, %11, %c0_i32_2 : i32
    scf.if %12 {
      %13 = tpu.iota {dimensions = array<i32: 0>} : vector<24x384xi32>
      %c16_i32 = arith.constant 16 : i32
      %14 = vector.broadcast %c16_i32 : i32 to vector<24x384xi32>
      %15 = arith.cmpi slt, %13, %14 : vector<24x384xi32>
      %16 = arith.select %15, %6, %0 : vector<24x384xi1>, vector<24x384xf32>
      %c0_3 = arith.constant 0 : index
      %c0_4 = arith.constant 0 : index
      %17 = vector.load %arg2[%c0_3, %c0_4] : memref<24x384xf32, #tpu.memory_space<vmem>>, vector<24x384xf32>
      tpu.vector_store %arg2[%c0_3, %c0_4], %16 {strides = array<i32>} : memref<24x384xf32, #tpu.memory_space<vmem>>, vector<24x384xf32>,
    } else {
    }
    return
  }
  func.func @transform_0(%arg0: i32) -> (i32, i32) {
    %c0_i32 = arith.constant 0 : i32
    %c0_i32_0 = arith.constant 0 : i32
    return %arg0, %c0_i32 : i32, i32
  }
  func.func @transform_1(%arg0: i32) -> (i32, i32) {
    %c0_i32 = arith.constant 0 : i32
    %c0_i32_0 = arith.constant 0 : i32
    return %arg0, %c0_i32 : i32, i32
  }
}

module attributes {stable_mosaic.version = 11 : i64} {
  func.func @_transe_loss_kernel(%arg0: i32, %arg1: memref<8x384xf32, #tpu.memory_space<vmem>>, %arg2: memref<8x384xf32, #tpu.memory_space<vmem>>, %arg3: memref<8x384xf32, #tpu.memory_space<vmem>>, %arg4: memref<8x384xf32, #tpu.memory_space<vmem>>, %arg5: memref<8x384xf32, #tpu.memory_space<vmem>>, %arg6: memref<8x384xf32, #tpu.memory_space<vmem>>, %arg7: memref<8x384xf32, #tpu.memory_space<vmem>>, %arg8: memref<8x384xf32, #tpu.memory_space<vmem>>, %arg9: memref<3x8xf32, #tpu.memory_space<vmem>>) attributes {dimension_semantics = [#tpu.dimension_semantics<parallel>], iteration_bounds = array<i64: 1>, scalar_prefetch = 0 : i64, scratch_operands = 0 : i64, tpu.core_type = #tpu.core_type<tc>, window_params = [{transform_indices = @transform_0, window_bounds = array<i64: 8, 384>}, {transform_indices = @transform_1, window_bounds = array<i64: 8, 384>}, {transform_indices = @transform_2, window_bounds = array<i64: 8, 384>}, {transform_indices = @transform_3, window_bounds = array<i64: 8, 384>}, {transform_indices = @transform_4, window_bounds = array<i64: 8, 384>}, {transform_indices = @transform_5, window_bounds = array<i64: 8, 384>}, {transform_indices = @transform_6, window_bounds = array<i64: 8, 384>}, {transform_indices = @transform_7, window_bounds = array<i64: 8, 384>}, {transform_indices = @transform_8, window_bounds = array<i64: 3, 8>}]} {
    %c0 = arith.constant 0 : index
    %c0_0 = arith.constant 0 : index
    %0 = vector.load %arg1[%c0, %c0_0] : memref<8x384xf32, #tpu.memory_space<vmem>>, vector<8x384xf32>
    %c0_1 = arith.constant 0 : index
    %c0_2 = arith.constant 0 : index
    %1 = vector.load %arg2[%c0_1, %c0_2] : memref<8x384xf32, #tpu.memory_space<vmem>>, vector<8x384xf32>
    %2 = arith.addf %0, %1 : vector<8x384xf32>
    %cst = arith.constant 5.000000e-01 : f32
    %3 = vector.broadcast %cst : f32 to vector<8x384xf32>
    %4 = arith.mulf %2, %3 : vector<8x384xf32>
    %c0_3 = arith.constant 0 : index
    %c0_4 = arith.constant 0 : index
    %5 = vector.load %arg3[%c0_3, %c0_4] : memref<8x384xf32, #tpu.memory_space<vmem>>, vector<8x384xf32>
    %6 = arith.addf %4, %5 : vector<8x384xf32>
    %c0_5 = arith.constant 0 : index
    %c0_6 = arith.constant 0 : index
    %7 = vector.load %arg4[%c0_5, %c0_6] : memref<8x384xf32, #tpu.memory_space<vmem>>, vector<8x384xf32>
    %8 = arith.subf %6, %7 : vector<8x384xf32>
    %9 = math.absf %8 : vector<8x384xf32>
    %cst_7 = arith.constant dense<0.000000e+00> : vector<8xf32>
    %10 = vector.multi_reduction <add>, %9, %cst_7 [1] : vector<8x384xf32> to vector<8xf32>
    %c0_8 = arith.constant 0 : index
    %c0_9 = arith.constant 0 : index
    %11 = vector.load %arg5[%c0_8, %c0_9] : memref<8x384xf32, #tpu.memory_space<vmem>>, vector<8x384xf32>
    %c0_10 = arith.constant 0 : index
    %c0_11 = arith.constant 0 : index
    %12 = vector.load %arg6[%c0_10, %c0_11] : memref<8x384xf32, #tpu.memory_space<vmem>>, vector<8x384xf32>
    %13 = arith.addf %11, %12 : vector<8x384xf32>
    %cst_12 = arith.constant 5.000000e-01 : f32
    %14 = vector.broadcast %cst_12 : f32 to vector<8x384xf32>
    %15 = arith.mulf %13, %14 : vector<8x384xf32>
    %c0_13 = arith.constant 0 : index
    %c0_14 = arith.constant 0 : index
    %16 = vector.load %arg7[%c0_13, %c0_14] : memref<8x384xf32, #tpu.memory_space<vmem>>, vector<8x384xf32>
    %17 = arith.addf %15, %16 : vector<8x384xf32>
    %c0_15 = arith.constant 0 : index
    %c0_16 = arith.constant 0 : index
    %18 = vector.load %arg8[%c0_15, %c0_16] : memref<8x384xf32, #tpu.memory_space<vmem>>, vector<8x384xf32>
    %19 = arith.subf %17, %18 : vector<8x384xf32>
    %20 = math.absf %19 : vector<8x384xf32>
    %cst_17 = arith.constant dense<0.000000e+00> : vector<8xf32>
    %21 = vector.multi_reduction <add>, %20, %cst_17 [1] : vector<8x384xf32> to vector<8xf32>
    %22 = arith.subf %10, %21 : vector<8xf32>
    %cst_18 = arith.constant 1.000000e+00 : f32
    %23 = vector.broadcast %cst_18 : f32 to vector<8xf32>
    %24 = arith.addf %22, %23 : vector<8xf32>
    %cst_19 = arith.constant 0.000000e+00 : f32
    %25 = vector.broadcast %cst_19 : f32 to vector<8xf32>
    %26 = arith.maximumf %24, %25 : vector<8xf32>
    %27 = vector.shape_cast %26 : vector<8xf32> to vector<1x8xf32>
    %28 = vector.shape_cast %10 : vector<8xf32> to vector<1x8xf32>
    %29 = vector.shape_cast %21 : vector<8xf32> to vector<1x8xf32>
    %30 = tpu.concatenate %27, %28, %29 in 0 : vector<1x8xf32>, vector<1x8xf32>, vector<1x8xf32> -> vector<3x8xf32>
    %c0_20 = arith.constant 0 : index
    %c0_21 = arith.constant 0 : index
    %31 = vector.load %arg9[%c0_20, %c0_21] : memref<3x8xf32, #tpu.memory_space<vmem>>, vector<3x8xf32>
    tpu.vector_store %arg9[%c0_20, %c0_21], %30 {strides = array<i32>} : memref<3x8xf32, #tpu.memory_space<vmem>>, vector<3x8xf32>,
    return
  }
  func.func @transform_0(%arg0: i32) -> (i32, i32) {
    %c0_i32 = arith.constant 0 : i32
    %c0_i32_0 = arith.constant 0 : i32
    return %arg0, %c0_i32 : i32, i32
  }
  func.func @transform_1(%arg0: i32) -> (i32, i32) {
    %c0_i32 = arith.constant 0 : i32
    %c0_i32_0 = arith.constant 0 : i32
    return %arg0, %c0_i32 : i32, i32
  }
  func.func @transform_2(%arg0: i32) -> (i32, i32) {
    %c0_i32 = arith.constant 0 : i32
    %c0_i32_0 = arith.constant 0 : i32
    return %arg0, %c0_i32 : i32, i32
  }
  func.func @transform_3(%arg0: i32) -> (i32, i32) {
    %c0_i32 = arith.constant 0 : i32
    %c0_i32_0 = arith.constant 0 : i32
    return %arg0, %c0_i32 : i32, i32
  }
  func.func @transform_4(%arg0: i32) -> (i32, i32) {
    %c0_i32 = arith.constant 0 : i32
    %c0_i32_0 = arith.constant 0 : i32
    return %arg0, %c0_i32 : i32, i32
  }
  func.func @transform_5(%arg0: i32) -> (i32, i32) {
    %c0_i32 = arith.constant 0 : i32
    %c0_i32_0 = arith.constant 0 : i32
    return %arg0, %c0_i32 : i32, i32
  }
  func.func @transform_6(%arg0: i32) -> (i32, i32) {
    %c0_i32 = arith.constant 0 : i32
    %c0_i32_0 = arith.constant 0 : i32
    return %arg0, %c0_i32 : i32, i32
  }
  func.func @transform_7(%arg0: i32) -> (i32, i32) {
    %c0_i32 = arith.constant 0 : i32
    %c0_i32_0 = arith.constant 0 : i32
    return %arg0, %c0_i32 : i32, i32
  }
  func.func @transform_8(%arg0: i32) -> (i32, i32) {
    %c0_i32 = arith.constant 0 : i32
    %c0_i32_0 = arith.constant 0 : i32
    return %c0_i32, %arg0 : i32, i32
  }
}

</mosaic_0001>

<bundles_post_ra>
// kernel: transe_forward.2
= control target key start
LH: loop header
LB: loop body
LE: loop exit
PB: predicated region body
PF: predicated region fallthrough
CT: control target
= control target key end

     0   :  { %s164_s0 = inlined_call_operand.vmem [shape: f32[17,384], index: 0, kind: input, shape index: {}, may-alias: {0,1}]   ;;  %s165_s1 = inlined_call_operand.vmem [shape: f32[17,384], index: 1, kind: output, shape index: {}, may-alias: {0,1}]  }
   0x1   :  { %v8_v0 = vld [vmem:[%s164_s0] sm:$0xff]  ;;  %v9_v1 = vld [vmem:[%s164_s0 + $0x8] sm:$0xff]  ;;  %v10_v2 = vld [vmem:[%s164_s0 + $0x10] sm:$0xff] }
   0x2   :  { %v14_v3 = vld [vmem:[%s164_s0 + $0x30] sm:$0xff]  ;;  %v15_v4 = vld [vmem:[%s164_s0 + $0x38] sm:$0xff]  ;;  %v16_v5 = vld [vmem:[%s164_s0 + $0x40] sm:$0xff]  ;;  %v17_v6 = vmul.f32 %v8_v0, %v8_v0  ;;  %v18_v7 = vmul.f32 %v9_v1, %v9_v1  ;;  %v19_v8 = vmul.f32 %v10_v2, %v10_v2 }
   0x3   :  { %89 = vst [vmem:[%s165_s1 + $0x30] sm:$0xff] %v14_v3  ;;  %90 = vst [vmem:[%s165_s1 + $0x38] sm:$0xff] %v15_v4 }
   0x4   :  { %91 = vst [vmem:[%s165_s1 + $0x40] sm:$0xff] %v16_v5  ;;  %v26_v12 = vadd.f32 %v18_v7, %v17_v6 }
   0x6   :  { %v27_v16 = vadd.f32 %v26_v12, %v19_v8 }
   0x8   :  { %28 = vadd.xlane.f32.xlu0 %v27_v16 }
   0xb   :  { %v11_v9 = vld [vmem:[%s164_s0 + $0x18] sm:$0xff]  ;;  %v12_v10 = vld [vmem:[%s164_s0 + $0x20] sm:$0xff]  ;;  %v13_v11 = vld [vmem:[%s164_s0 + $0x28] sm:$0xff] }
   0xc   :  { %v20_v13 = vmul.f32 %v11_v9, %v11_v9  ;;  %v21_v14 = vmul.f32 %v12_v10, %v12_v10  ;;  %v22_v15 = vmul.f32 %v13_v11, %v13_v11 }
   0xe   :  { %v30_v17 = vadd.f32 %v21_v14, %v20_v13 }
  0x10   :  { %v31_v18 = vadd.f32 %v30_v17, %v22_v15 }
  0x12   :  { %32 = vadd.xlane.f32.xlu0 %v31_v18 }
  0x95   :  { %v29_v19 = vpop.xlane.xlu0 %28 }
  0x96   :  { %96 = vrsqrt.f32 %v29_v19 }
  0x9f   :  { %v33_v20 = vpop.xlane.xlu0 %32 }
  0xa0   :  { %98 = vrsqrt.f32 %v33_v20  ;;  %v97_v21 = vpop.eup %96 }
  0xa1   :  { %v41_v22 = vmul.f32 %v97_v21, %v8_v0  ;;  %v42_v23 = vmul.f32 %v97_v21, %v9_v1  ;;  %v43_v24 = vmul.f32 %v97_v21, %v10_v2 }
  0xa3   :  { %83 = vst [vmem:[%s165_s1] sm:$0xff] %v41_v22  ;;  %84 = vst [vmem:[%s165_s1 + $0x8] sm:$0xff] %v42_v23 }
  0xa4   :  { %85 = vst [vmem:[%s165_s1 + $0x10] sm:$0xff] %v43_v24 }
  0xaa   :  { %v99_v25 = vpop.eup %98 }
  0xab   :  { %v44_v26 = vmul.f32 %v99_v25, %v11_v9  ;;  %v45_v27 = vmul.f32 %v99_v25, %v12_v10  ;;  %v46_v28 = vmul.f32 %v99_v25, %v13_v11 }
  0xad   :  { %86 = vst [vmem:[%s165_s1 + $0x18] sm:$0xff] %v44_v26  ;;  %87 = vst [vmem:[%s165_s1 + $0x20] sm:$0xff] %v45_v27 }
  0xae   :  { %88 = vst [vmem:[%s165_s1 + $0x28] sm:$0xff] %v46_v28 }

// kernel: transe_forward.3
= control target key start
LH: loop header
LB: loop body
LE: loop exit
PB: predicated region body
PF: predicated region fallthrough
CT: control target
= control target key end

     0   :  { %v95_v58 = vlaneseq  ;;  %vm114_vm0 = vcmask 1040384   ;;  %vm116_vm1 = vcmask 1041408   ;;  %vm118_vm2 = vcmask 59392   ;;  %s244_s0 = inlined_call_operand.vmem [shape: f32[8,384], index: 0, kind: input, shape index: {}]   ;;  %s245_s1 = inlined_call_operand.vmem [shape: f32[8,384], index: 1, kind: input, shape index: {}]   ;;  %s246_s2 = inlined_call_operand.vmem [shape: f32[8,384], index: 2, kind: input, shape index: {}]   ;;  %s247_s3 = inlined_call_operand.vmem [shape: f32[8,384], index: 3, kind: input, shape index: {}]   ;;  %s248_s4 = inlined_call_operand.vmem [shape: f32[8,384], index: 4, kind: input, shape index: {}]   ;;  %s249_s5 = inlined_call_operand.vmem [shape: f32[8,384], index: 5, kind: input, shape index: {}]   ;;  %s250_s6 = inlined_call_operand.vmem [shape: f32[8,384], index: 6, kind: input, shape index: {}]   ;;  %s251_s7 = inlined_call_operand.vmem [shape: f32[8,384], index: 7, kind: input, shape index: {}]   ;;  %s252_s8 = inlined_call_operand.vmem [shape: f32[3,8], index: 8, kind: output, shape index: {}]  }
   0x1   :  { %v29_v0 = vld [vmem:[%s244_s0] sm:$0xff]  ;;  %v30_v1 = vld [vmem:[%s244_s0 + $0x8] sm:$0xff]  ;;  %v31_v2 = vld [vmem:[%s244_s0 + $0x10] sm:$0xff] }
   0x2   :  { %v32_v3 = vld [vmem:[%s245_s1] sm:$0xff]  ;;  %v33_v4 = vld [vmem:[%s245_s1 + $0x8] sm:$0xff]  ;;  %v34_v5 = vld [vmem:[%s245_s1 + $0x10] sm:$0xff]  ;;  %v96_v60 = vand.u32 127, %v95_v58  ;;  %v98_v61 = vshrl.u32 %v95_v58, 7 }
   0x3   :  { %v35_v6 = vadd.f32 %v32_v3, %v29_v0  ;;  %v36_v7 = vadd.f32 %v33_v4, %v30_v1  ;;  %v37_v8 = vadd.f32 %v34_v5, %v31_v2  ;;  %v41_v9 = vld [vmem:[%s246_s2] sm:$0xff]  ;;  %v42_v10 = vld [vmem:[%s246_s2 + $0x8] sm:$0xff]  ;;  %v43_v11 = vld [vmem:[%s246_s2 + $0x10] sm:$0xff] }
   0x4   :  { %v47_v12 = vld [vmem:[%s247_s3] sm:$0xff]  ;;  %v48_v13 = vld [vmem:[%s247_s3 + $0x8] sm:$0xff]  ;;  %v49_v14 = vld [vmem:[%s247_s3 + $0x10] sm:$0xff]  ;;  %v99_v0 = vsub.s32 %v96_v60, %v98_v61 }
   0x5   :  { %v38_v15 = vmul.f32 0.5, %v35_v6  ;;  %v39_v16 = vmul.f32 0.5, %v36_v7  ;;  %v40_v17 = vmul.f32 0.5, %v37_v8  ;;  %v60_v18 = vld [vmem:[%s248_s4] sm:$0xff]  ;;  %v61_v19 = vld [vmem:[%s248_s4 + $0x8] sm:$0xff]  ;;  %v62_v20 = vld [vmem:[%s248_s4 + $0x10] sm:$0xff] }
   0x6   :  { %v63_v21 = vld [vmem:[%s249_s5] sm:$0xff]  ;;  %v64_v22 = vld [vmem:[%s249_s5 + $0x8] sm:$0xff]  ;;  %v65_v23 = vld [vmem:[%s249_s5 + $0x10] sm:$0xff] }
   0x7   :  { %v44_v24 = vadd.f32 %v41_v9, %v38_v15  ;;  %v45_v25 = vadd.f32 %v42_v10, %v39_v16  ;;  %v46_v26 = vadd.f32 %v43_v11, %v40_v17  ;;  %v66_v27 = vadd.f32 %v63_v21, %v60_v18  ;;  %v72_v30 = vld [vmem:[%s250_s6] sm:$0xff]  ;;  %v73_v35 = vld [vmem:[%s250_s6 + $0x8] sm:$0xff]  ;;  %v74_v36 = vld [vmem:[%s250_s6 + $0x10] sm:$0xff] }
   0x8   :  { %v67_v28 = vadd.f32 %v64_v22, %v61_v19  ;;  %v68_v29 = vadd.f32 %v65_v23, %v62_v20  ;;  %v78_v39 = vld [vmem:[%s251_s7] sm:$0xff]  ;;  %v79_v40 = vld [vmem:[%s251_s7 + $0x8] sm:$0xff]  ;;  %v80_v41 = vld [vmem:[%s251_s7 + $0x10] sm:$0xff] }
   0x9   :  { %v50_v31 = vsub.f32 %v44_v24, %v47_v12  ;;  %v51_v32 = vsub.f32 %v45_v25, %v48_v13  ;;  %v52_v33 = vsub.f32 %v46_v26, %v49_v14  ;;  %v69_v34 = vmul.f32 0.5, %v66_v27 }
   0xa   :  { %v70_v37 = vmul.f32 0.5, %v67_v28  ;;  %v71_v38 = vmul.f32 0.5, %v68_v29 }
   0xb   :  { %v53_v42 = vand.u32 2147483647, %v50_v31  ;;  %v54_v43 = vand.u32 2147483647, %v51_v32  ;;  %v55_v44 = vand.u32 2147483647, %v52_v33  ;;  %v75_v45 = vadd.f32 %v72_v30, %v69_v34 }
   0xc   :  { %v76_v46 = vadd.f32 %v73_v35, %v70_v37  ;;  %v77_v47 = vadd.f32 %v74_v36, %v71_v38 }
   0xd   :  { %v56_v48 = vadd.f32 %v54_v43, %v53_v42  ;;  %v81_v49 = vsub.f32 %v75_v45, %v78_v39 }
   0xe   :  { %v82_v50 = vsub.f32 %v76_v46, %v79_v40  ;;  %v83_v51 = vsub.f32 %v77_v47, %v80_v41 }
   0xf   :  { %v57_v52 = vadd.f32 %v56_v48, %v55_v44  ;;  %v84_v53 = vand.u32 2147483647, %v81_v49 }
  0x10   :  { %v85_v54 = vand.u32 2147483647, %v82_v50  ;;  %v86_v55 = vand.u32 2147483647, %v83_v51 }
  0x11   :  { %58 = vadd.xlane.f32.xlu0 %v57_v52 }
  0x12   :  { %v87_v56 = vadd.f32 %v85_v54, %v84_v53 }
  0x14   :  { %v88_v57 = vadd.f32 %v87_v56, %v86_v55 }
  0x16   :  { %89 = vadd.xlane.f32.xlu0 %v88_v57 }
  0x9e   :  { %v59_v59 = vpop.xlane.xlu0 %58 }
  0x9f   :  { %v106_v3 = vrot.slane %v59_v59, %v99_v0 }
  0xa3   :  { %v90_v62 = vpop.xlane.xlu0 %89 }
  0xa4   :  { %v91_v63 = vsub.f32 %v59_v59, %v90_v62  ;;  %v112_v5 = vrot.slane %v90_v62, %v99_v0 }
  0xa6   :  { %v92_v1 = vadd.f32 1.0, %v91_v63 }
  0xa8   :  { %v93_v2 = vmax.f32 %v92_v1, 0.0 }
  0xaa   :  { %v100_v4 = vrot.slane %v93_v2, %v99_v0 }
  0xac   :  { %v115_v6 = vsel %vm114_vm0, %v100_v4, %v106_v3 }
  0xad   :  { %v117_v7 = vsel %vm116_vm1, %v115_v6, %v112_v5 }
  0xae   :  { %119 = vst.msk [vmem:[%s252_s8] sm:$0x7] %vm118_vm2, %v117_v7 }

</bundles_post_ra>
